<compile_context>
chip_gen: v7x
topology: tpu7x:2x2x1
jax: 0.10.0
libtpu: 0.0.40
codegen_flags: <defaults>
</compile_context>

<pallas_src>
import math
import functools

import jax
import jax.numpy as jnp
from jax.experimental import pallas as pl
from jax.experimental.pallas import tpu as pltpu


_LANE = 128
_SUBLANE = 8
# Per-grid-step VMEM *data* budget (double-buffered input + output blocks).
# Kept at ~16 MiB so that, with the 32 MiB scoped-VMEM limit requested below,
# the tiling is safe on v5e (16 MiB default scoped), v6e (128 MiB physical)
# and v7x (64 MiB physical / 32 MiB default scoped) alike.
_VMEM_DATA_BUDGET = 16 * 1024 * 1024
_MAX_TILE_N = 2048
_MAX_TILE_D = 1024


def _round_up(x, m):
    return (x + m - 1) // m * m


def _choose_tiles(n_views, n_rows, feat_dim, itemsize):
    """Pick (tile_n, tile_d) that fit the double-buffered VMEM budget."""
    # --- D (lane) tile: multiple of 128 that divides D, else the full dim ----
    if feat_dim % _LANE == 0:
        td = min(feat_dim, _MAX_TILE_D)
        while feat_dim % td != 0:
            td -= _LANE
    else:
        # block == full array dim is always legal (stores become masked; perf
        # hit only, numerics unaffected).
        td = feat_dim

    # --- N (sublane) tile: largest multiple of 8 fitting the budget ----------
    # Per N-row of a block, double-buffered: V x-rows in + 1 out-row (bias is
    # negligible, weights live in SMEM).
    bytes_per_row = 2 * (n_views + 1) * td * itemsize
    tn = _VMEM_DATA_BUDGET // max(bytes_per_row, 1)
    tn = max(_SUBLANE, (tn // _SUBLANE) * _SUBLANE)
    tn = min(tn, _MAX_TILE_N, _round_up(n_rows, _SUBLANE))
    return tn, td


def _fusion_kernel(w_ref, x_ref, b_ref, o_ref, *, n_views):
    # w_ref : SMEM (V,)  f32   per-view scalar weights
    # x_ref : VMEM (V, tn, td)
    # b_ref : VMEM (1, td)
    # o_ref : VMEM (tn, td)
    #
    # Accumulate in f32 on the VPU (scalar * vreg FMAs).  Start the accumulator
    # with the first weighted view -- no zeros + extra vadd.  astype(f32) is a
    # no-op when the input is already f32.
    acc = x_ref[0].astype(jnp.float32) * w_ref[0]
    for i in range(1, n_views):  # static unrolled loop over views (V is small)
        acc = acc + x_ref[i].astype(jnp.float32) * w_ref[i]
    acc = acc + b_ref[...].astype(jnp.float32)
    o_ref[...] = acc.astype(o_ref.dtype)


def weight_fusion(x, weight, bias=None, *, tile_n=None, tile_d=None):
    """x: (V, N, D); weight: (1, 1, V); bias: (D,) or None -> (N, D)."""
    V, N, D = x.shape
    if bias is None:
        bias = jnp.zeros((D,), x.dtype)

    tn_auto, td_auto = _choose_tiles(V, N, D, x.dtype.itemsize)
    tn = tile_n if tile_n is not None else tn_auto
    td = tile_d if tile_d is not None else td_auto

    # Pad N so the grid divides evenly; the extra (zero) rows are sliced off.
    Np = _round_up(N, tn)
    if Np != N:
        x = jnp.pad(x, ((0, 0), (0, Np - N), (0, 0)))

    w_flat = weight.reshape(V).astype(jnp.float32)   # SMEM scalars
    b_row = bias.reshape(1, D)

    kernel = functools.partial(_fusion_kernel, n_views=V)
    out = pl.pallas_call(
        kernel,
        out_shape=jax.ShapeDtypeStruct((Np, D), x.dtype),
        grid_spec=pl.GridSpec(
            grid=(Np // tn, D // td),
            in_specs=[
                pl.BlockSpec(memory_space=pltpu.MemorySpace.SMEM),   # weights
                pl.BlockSpec((V, tn, td), lambda i, j: (0, i, j)),   # x tile
                pl.BlockSpec((1, td), lambda i, j: (0, j)),          # bias row
            ],
            out_specs=pl.BlockSpec((tn, td), lambda i, j: (i, j)),
        ),
        compiler_params=pltpu.CompilerParams(
            dimension_semantics=("parallel", "parallel"),
            vmem_limit_bytes=32 * 1024 * 1024,
        ),
    )(w_flat, x, b_row)
    return out[:N] if Np != N else out


def init_params(key, feat_views, feat_dim):
    # Mirror PyTorch reset_parameters():
    #   kaiming_uniform_(weight, a=sqrt(5)) on shape (1,1,V) -> fan_in = V,
    #   bound = sqrt(6 / ((1 + a^2) * fan_in)) = 1/sqrt(V)
    #   bias  ~ U(-1/sqrt(fan_in), 1/sqrt(fan_in))
    kw, kb = jax.random.split(key)
    w_bound = 1.0 / math.sqrt(feat_views)
    weight = jax.random.uniform(kw, (1, 1, feat_views), jnp.float32,
                                minval=-w_bound, maxval=w_bound)
    b_bound = 1.0 / math.sqrt(feat_views)
    bias = jax.random.uniform(kb, (feat_dim,), jnp.float32,
                              minval=-b_bound, maxval=b_bound)
    return weight, bias


if __name__ == "__main__":
    feat_views, N, feat_dim = 4, 16, 128

    key = jax.random.PRNGKey(0)
    kx, kp = jax.random.split(key)
    x = jax.random.normal(kx, (feat_views, N, feat_dim), jnp.float32)
    weight, bias = init_params(kp, feat_views, feat_dim)

    out = weight_fusion(x, weight, bias)
    out = jax.block_until_ready(out)

    # reference (pure JAX, mirrors the PyTorch forward)
    ref = jnp.sum(x * weight.reshape(feat_views, 1, 1), axis=0) + bias
    assert out.shape == (N, feat_dim)
    assert jnp.allclose(out, ref, atol=1e-5, rtol=1e-5)

    print("KERNEL_OK")
</pallas_src>

<mosaic_0001>
module attributes {stable_mosaic.version = 11 : i64} {
  func.func @_fusion_kernel(%arg0: i32, %arg1: i32, %arg2: memref<4xf32, #tpu.memory_space<smem>>, %arg3: memref<4x16x128xf32, #tpu.memory_space<vmem>>, %arg4: memref<1x128xf32, #tpu.memory_space<vmem>>, %arg5: memref<16x128xf32, #tpu.memory_space<vmem>>) attributes {dimension_semantics = [#tpu.dimension_semantics<parallel>, #tpu.dimension_semantics<parallel>], iteration_bounds = array<i64: 1, 1>, scalar_prefetch = 0 : i64, scratch_operands = 0 : i64, tpu.core_type = #tpu.core_type<tc>, window_params = [{transform_indices = @transform_0, window_bounds = array<i64: 4>}, {transform_indices = @transform_1, window_bounds = array<i64: 4, 16, 128>}, {transform_indices = @transform_2, window_bounds = array<i64: 1, 128>}, {transform_indices = @transform_3, window_bounds = array<i64: 16, 128>}]} {
    %c0 = arith.constant 0 : index
    %c0_0 = arith.constant 0 : index
    %c0_1 = arith.constant 0 : index
    %0 = vector.load %arg3[%c0, %c0_0, %c0_1] : memref<4x16x128xf32, #tpu.memory_space<vmem>>, vector<1x16x128xf32>
    %1 = vector.shape_cast %0 : vector<1x16x128xf32> to vector<16x128xf32>
    %c0_2 = arith.constant 0 : index
    %2 = memref.load %arg2[%c0_2] : memref<4xf32, #tpu.memory_space<smem>>
    %3 = vector.broadcast %2 : f32 to vector<16x128xf32>
    %4 = arith.mulf %1, %3 : vector<16x128xf32>
    %c1 = arith.constant 1 : index
    %c0_3 = arith.constant 0 : index
    %c0_4 = arith.constant 0 : index
    %5 = vector.load %arg3[%c1, %c0_3, %c0_4] : memref<4x16x128xf32, #tpu.memory_space<vmem>>, vector<1x16x128xf32>
    %6 = vector.shape_cast %5 : vector<1x16x128xf32> to vector<16x128xf32>
    %c1_5 = arith.constant 1 : index
    %7 = memref.load %arg2[%c1_5] : memref<4xf32, #tpu.memory_space<smem>>
    %8 = vector.broadcast %7 : f32 to vector<16x128xf32>
    %9 = arith.mulf %6, %8 : vector<16x128xf32>
    %10 = arith.addf %4, %9 : vector<16x128xf32>
    %c2 = arith.constant 2 : index
    %c0_6 = arith.constant 0 : index
    %c0_7 = arith.constant 0 : index
    %11 = vector.load %arg3[%c2, %c0_6, %c0_7] : memref<4x16x128xf32, #tpu.memory_space<vmem>>, vector<1x16x128xf32>
    %12 = vector.shape_cast %11 : vector<1x16x128xf32> to vector<16x128xf32>
    %c2_8 = arith.constant 2 : index
    %13 = memref.load %arg2[%c2_8] : memref<4xf32, #tpu.memory_space<smem>>
    %14 = vector.broadcast %13 : f32 to vector<16x128xf32>
    %15 = arith.mulf %12, %14 : vector<16x128xf32>
    %16 = arith.addf %10, %15 : vector<16x128xf32>
    %c3 = arith.constant 3 : index
    %c0_9 = arith.constant 0 : index
    %c0_10 = arith.constant 0 : index
    %17 = vector.load %arg3[%c3, %c0_9, %c0_10] : memref<4x16x128xf32, #tpu.memory_space<vmem>>, vector<1x16x128xf32>
    %18 = vector.shape_cast %17 : vector<1x16x128xf32> to vector<16x128xf32>
    %c3_11 = arith.constant 3 : index
    %19 = memref.load %arg2[%c3_11] : memref<4xf32, #tpu.memory_space<smem>>
    %20 = vector.broadcast %19 : f32 to vector<16x128xf32>
    %21 = arith.mulf %18, %20 : vector<16x128xf32>
    %22 = arith.addf %16, %21 : vector<16x128xf32>
    %c0_12 = arith.constant 0 : index
    %c0_13 = arith.constant 0 : index
    %23 = vector.load %arg4[%c0_12, %c0_13] : memref<1x128xf32, #tpu.memory_space<vmem>>, vector<1x128xf32>
    %24 = vector.broadcast %23 : vector<1x128xf32> to vector<16x128xf32>
    %25 = arith.addf %22, %24 : vector<16x128xf32>
    %c0_14 = arith.constant 0 : index
    %c0_15 = arith.constant 0 : index
    %26 = vector.load %arg5[%c0_14, %c0_15] : memref<16x128xf32, #tpu.memory_space<vmem>>, vector<16x128xf32>
    tpu.vector_store %arg5[%c0_14, %c0_15], %25 {strides = array<i32>} : memref<16x128xf32, #tpu.memory_space<vmem>>, vector<16x128xf32>,
    return
  }
  func.func @transform_0(%arg0: i32, %arg1: i32) -> i32 {
    %c0_i32 = arith.constant 0 : i32
    %c0_i32_0 = arith.constant 0 : i32
    return %c0_i32 : i32
  }
  func.func @transform_1(%arg0: i32, %arg1: i32) -> (i32, i32, i32) {
    %c0_i32 = arith.constant 0 : i32
    %c0_i32_0 = arith.constant 0 : i32
    return %c0_i32, %arg0, %arg1 : i32, i32, i32
  }
  func.func @transform_2(%arg0: i32, %arg1: i32) -> (i32, i32) {
    %c0_i32 = arith.constant 0 : i32
    %c0_i32_0 = arith.constant 0 : i32
    return %c0_i32, %arg1 : i32, i32
  }
  func.func @transform_3(%arg0: i32, %arg1: i32) -> (i32, i32) {
    %c0_i32 = arith.constant 0 : i32
    return %arg0, %arg1 : i32, i32
  }
}

</mosaic_0001>

<bundles_post_ra>
// kernel: tpu_custom_call.1
= control target key start
LH: loop header
LB: loop body
LE: loop exit
PB: predicated region body
PF: predicated region fallthrough
CT: control target
= control target key end

     0   :  { %8 = vsyncpa [#allocation5], 0  ;;  %s241_s0 = inlined_call_operand.hbm [shape: f32[4], index: 0, kind: input, shape index: {}]   ;;  %s242_s1 = inlined_call_operand.hbm [shape: f32[4,16,128], index: 1, kind: input, shape index: {}]   ;;  %s243_s2 = inlined_call_operand.vmem [shape: f32[1,128], index: 2, kind: input, shape index: {}]   ;;  %s244_s3 = inlined_call_operand.hbm [shape: f32[16,128], index: 3, kind: output, shape index: {}]  }
   0x1   :  { %9 = vsyncpa [#allocation3], 0 }
   0x2   :  { %10 = vsyncpa [#allocation4], 0  ;;  %s111_s14 = scalar_lea.hbm %s241_s0, 16 }
   0x3   :  { %p112_p0 = scmp.ne.s32.totalorder %s241_s0, %s111_s14  ;;  %p115_p1 = scmp.lt.u32.totalorder %s111_s14, %s241_s0 }
   0x5   :  { %p117_p2 = pnand %p115_p1, %p112_p0 }
   0x7   :  { %120 = shalt.err (!%p117_p2)
}
   0x8   :  { %s171_s19 = smov [#allocation2]   ;;  %s172_s22 = smov [#allocation6]  }
   0x9   :  { %18 = dma.hbm_to_smem %s241_s0, 16, %s171_s19, [#allocation5]  }
   0xa   :  { %s24_s23 = sshll.u32 %s172_s22, 4  ;;  %s121_s26 = scalar_lea.hbm %s242_s1, 1024  ;;  %s25_s23 = int_to_ptr.vmem [resolvable:$true] %s24_s23 }
   0xb   :  { %p122_p3 = scmp.ne.s32.totalorder %s242_s1, %s121_s26  ;;  %p125_p4 = scmp.lt.u32.totalorder %s121_s26, %s242_s1 }
   0xd   :  { %p127_p5 = pnand %p125_p4, %p122_p3 }
   0xf   :  { %130 = shalt.err (!%p127_p5)
}
  0x10   :  { %s131_s4 = scalar_lea.vmem %s25_s23, 1024  ;;  %p136_p7 = scmp.lt.s32.totalorder %s25_s23, %s25_s23 }
  0x11   :  { %p132_p6 = scmp.ne.s32.totalorder %s25_s23, %s131_s4  ;;  %p137_p8 = scmp.lt.s32.totalorder %s131_s4, %s131_s4 }
  0x13   :  { %p138_p9 = por %p137_p8, %p136_p7 }
  0x15   :  { %p139_p10 = pnand %p138_p9, %p132_p6 }
  0x17   :  { %142 = shalt.err (!%p139_p10)
}
  0x18   :  { %s173_s0 = smov 128   ;;  %s174_s5 = smov 8  }
  0x19   :  { %30 = dma.hbm_to_vmem [thread:$0]  %s242_s1, 1024, %s25_s23, [#allocation3], %s173_s0, %s173_s0, %s174_s5  }
  0x1a   :  { %165 = dma.done.wait [#allocation5], 16  }
  0x1b   :  { %166 = vsyncadd [#allocation5], 4294967280 }
  0x1c   :  { %167 = dma.done.wait [#allocation3], 1024  }
  0x1d   :  { %168 = vsyncadd [#allocation3], 4294966272 }
  0x1e   :  { %39 = sfence }
  0x1f   :  { %s42_s8 = sld [smem:[#allocation2]]  ;;  %s102_s9 = sld [smem:[#allocation2 + $0x1]]  ;;  %v40_v0 = vld [vmem:[#allocation6] sm:$0xff]  ;;  %v47_v1 = vld [vmem:[#allocation6 + $0x10] sm:$0xff]  ;;  %v41_v3 = vld [vmem:[#allocation6 + $0x8] sm:$0xff] }
  0x20   :  { %s103_s10 = sld [smem:[#allocation2 + $0x2]]  ;;  %s104_s11 = sld [smem:[#allocation2 + $0x3]]  ;;  %v56_v2 = vld [vmem:[#allocation6 + $0x20] sm:$0xff]  ;;  %v48_v4 = vld [vmem:[#allocation6 + $0x18] sm:$0xff]  ;;  %v65_v7 = vld [vmem:[#allocation6 + $0x30] sm:$0xff] }
  0x21   :  { %v57_v8 = vld [vmem:[#allocation6 + $0x28] sm:$0xff]  ;;  %v66_v13 = vld [vmem:[#allocation6 + $0x38] sm:$0xff]  ;;  %v105_v23 = vld [vmem:[%s243_s2] ss:$0 sm:$0xff]  ;;  %s175_s13 = smov [#allocation7]  }
  0x22   :  { %s89_s14 = sshll.u32 %s175_s13, 4  ;;  %s90_s14 = int_to_ptr.vmem [resolvable:$true] %s89_s14 }
  0x23   :  { %s143_s15 = scalar_lea.vmem %s90_s14, 256  ;;  %p148_p12 = scmp.lt.s32.totalorder %s90_s14, %s90_s14 }
  0x24   :  { %p144_p11 = scmp.ne.s32.totalorder %s90_s14, %s143_s15  ;;  %p149_p13 = scmp.lt.s32.totalorder %s143_s15, %s143_s15 }
  0x25   :  { %v43_v5 = vstv %s42_s8  ;;  %v50_v6 = vstv %s102_s9 }
  0x26   :  { %v44_v9 = vmul.f32 %v43_v5, %v40_v0  ;;  %v51_v10 = vmul.f32 %v50_v6, %v47_v1  ;;  %v59_v11 = vstv %s103_s10  ;;  %v68_v12 = vstv %s104_s11  ;;  %p150_p0 = por %p149_p13, %p148_p12 }
  0x27   :  { %v60_v14 = vmul.f32 %v59_v11, %v56_v2  ;;  %v45_v15 = vmul.f32 %v43_v5, %v41_v3  ;;  %v52_v16 = vmul.f32 %v50_v6, %v48_v4  ;;  %v69_v18 = vmul.f32 %v68_v12, %v65_v7 }
  0x28   :  { %v53_v17 = vadd.f32 %v51_v10, %v44_v9  ;;  %v61_v19 = vmul.f32 %v59_v11, %v57_v8  ;;  %v70_v21 = vmul.f32 %v68_v12, %v66_v13  ;;  %p151_p1 = pnand %p150_p0, %p144_p11 }
  0x29   :  { %v54_v20 = vadd.f32 %v52_v16, %v45_v15 }
  0x2a   :  { %v62_v22 = vadd.f32 %v60_v14, %v53_v17 }
  0x2b   :  { %v63_v24 = vadd.f32 %v61_v19, %v54_v20 }
  0x2c   :  { %v71_v25 = vadd.f32 %v69_v18, %v62_v22 }
  0x2d   :  { %v72_v26 = vadd.f32 %v70_v21, %v63_v24 }
  0x2e   :  { %v80_v27 = vadd.f32 %v105_v23, %v71_v25 }
  0x2f   :  { %v81_v28 = vadd.f32 %v105_v23, %v72_v26 }
  0x30   :  { %82 = vst [vmem:[#allocation7] sm:$0xff] %v80_v27 }
  0x31   :  { %83 = vst [vmem:[#allocation7 + $0x8] sm:$0xff] %v81_v28 }
  0x32   :  { %154 = shalt.err (!%p151_p1)
}
  0x33   :  { %s155_s2 = scalar_lea.hbm %s244_s3, 256 }
  0x34   :  { %p156_p2 = scmp.ne.s32.totalorder %s244_s3, %s155_s2  ;;  %p159_p3 = scmp.lt.u32.totalorder %s155_s2, %s244_s3 }
  0x36   :  { %p161_p4 = pnand %p159_p3, %p156_p2 }
  0x38   :  { %164 = shalt.err (!%p161_p4)
}
  0x39   :  { %95 = dma.vmem_to_hbm [thread:$0]  %s90_s14, 256, %s244_s3, [#allocation4], %s173_s0, %s173_s0, %s174_s5  }
  0x3a   :  { %169 = dma.done.wait [#allocation4], 256  }
  0x3b   :  { %170 = vsyncadd [#allocation4], 4294967040 }
  0x3c   :  { %99 = vsyncpa [#allocation3], 1 }
  0x3d   :  { %100 = vsyncpa [#allocation4], 1 }
  0x3e   :  { %101 = vsyncpa [#allocation5], 1 }

</bundles_post_ra>
